<compile_context>
chip_gen: v6e
topology: v6e:2x2x1
jax: 0.10.0
libtpu: 0.0.40
codegen_flags: <defaults>
</compile_context>

<pallas_src>
import functools

import jax
import jax.numpy as jnp
from jax import lax
from jax.experimental import pallas as pl
from jax.experimental.pallas import tpu as pltpu

_LANES = 128
_SUBLANES = 8


def _focal_block(x, t, alpha, gamma):
    """Elementwise focal-loss term; x (logits) and t (float labels) are f32 tiles."""
    # Numerically-stable BCE-with-logits (matches F.binary_cross_entropy_with_logits).
    bce = jnp.maximum(x, 0.0) - x * t + jnp.log1p(jnp.exp(-jnp.abs(x)))
    # pt = exp(-bce): extra EUP op in an otherwise under-used slot, full precision.
    pt = jnp.exp(-bce)
    # at = [alpha, 1-alpha].gather(0, targets.long()) -> trunc-to-int selection.
    t_is_one = t.astype(jnp.int32) == 1
    at = jnp.where(t_is_one, 1.0 - alpha, alpha)
    g = float(gamma)
    if g == int(g):
        modulator = lax.integer_pow(1.0 - pt, int(g))   # VPU multiplies, not log+exp pow
    else:
        modulator = (1.0 - pt) ** g
    return at * modulator * bce


def _focal_sum_kernel(x_ref, t_ref, out_ref, *, alpha, gamma, block_rows,
                      n_valid, steps_per_core):
    c = pl.program_id(0)                      # TensorCore split ("parallel")
    i = pl.program_id(1)                      # sequential reduction axis ("arbitrary")
    block_elems = block_rows * _LANES
    gid = c * steps_per_core + i              # un-clamped logical block id
    block_start = gid * block_elems
    is_full = block_start + block_elems <= n_valid

    @pl.when(i == 0)
    def _init():
        out_ref[...] = jnp.zeros_like(out_ref)

    def _accumulate(f_loss):
        # Tree-reduce the (block_rows, 128) tile to a single (8,128) vreg in-register,
        # then a single VPU add into the resident output block.
        partial = jnp.sum(
            f_loss.reshape(block_rows // _SUBLANES, _SUBLANES, _LANES), axis=0)
        out_ref[...] += partial.reshape(1, _SUBLANES, _LANES)

    @pl.when(is_full)
    def _interior():                          # unmasked fast path (steady state)
        _accumulate(_focal_block(x_ref[...], t_ref[...], alpha, gamma))

    @pl.when(jnp.logical_not(is_full))
    def _edge():                              # partial / overshooting block only
        row = lax.broadcasted_iota(jnp.int32, (block_rows, _LANES), 0)
        lane = lax.broadcasted_iota(jnp.int32, (block_rows, _LANES), 1)
        # TODO(synk): int32 flat index overflows for N >= 2**31 elements.
        idx = block_start + row * _LANES + lane
        mask = idx < n_valid
        # Sanitize BEFORE transcendentals: out-of-bounds tile slots hold unspecified
        # VMEM bits (possible inf/NaN).
        x = jnp.where(mask, x_ref[...], 0.0)
        t = jnp.where(mask, t_ref[...], 0.0)
        f_loss = jnp.where(mask, _focal_block(x, t, alpha, gamma), 0.0)
        _accumulate(f_loss)


def weighted_focal_loss(inputs, targets, alpha=0.1, gamma=2, block_rows=2048,
                        num_cores=2):
    """inputs: (N,) logits; targets: (N,1) float labels in {0,1}. Returns scalar mean focal loss."""
    x = inputs.reshape(-1).astype(jnp.float32)
    t = targets.reshape(-1).astype(jnp.float32)
    n = x.shape[0]

    pad = (-n) % _LANES
    if pad:
        # Ragged tail only: one extra HBM pass. N % 128 == 0 takes the zero-copy reshape.
        x = jnp.pad(x, (0, pad))
        t = jnp.pad(t, (0, pad))
    rows = (n + pad) // _LANES
    xp = x.reshape(rows, _LANES)
    tp = t.reshape(rows, _LANES)

    block_rows = min(int(block_rows), rows)
    block_rows = max(_SUBLANES, -(-block_rows // _SUBLANES) * _SUBLANES)  # multiple of 8
    num_blocks = pl.cdiv(rows, block_rows)
    steps_per_core = pl.cdiv(num_blocks, num_cores)

    def in_index_map(c, i):
        # Clamp: overshooting (core, step) pairs re-read the last valid block; their
        # contribution is zeroed in-kernel via the mask (block_start >= n_valid).
        return (jnp.minimum(c * steps_per_core + i, num_blocks - 1), 0)

    kernel = functools.partial(
        _focal_sum_kernel,
        alpha=float(alpha), gamma=gamma, block_rows=block_rows,
        n_valid=n, steps_per_core=steps_per_core)

    partials = pl.pallas_call(
        kernel,
        out_shape=jax.ShapeDtypeStruct((num_cores, _SUBLANES, _LANES), jnp.float32),
        grid_spec=pltpu.PrefetchScalarGridSpec(
            num_scalar_prefetch=0,
            grid=(num_cores, steps_per_core),
            in_specs=[
                pl.BlockSpec((block_rows, _LANES), in_index_map),
                pl.BlockSpec((block_rows, _LANES), in_index_map),
            ],
            out_specs=pl.BlockSpec((1, _SUBLANES, _LANES), lambda c, i: (c, 0, 0)),
        ),
        compiler_params=pltpu.CompilerParams(
            dimension_semantics=("parallel", "arbitrary")),
    )(xp, tp)

    # Tiny epilogue: sum the 2 per-core (8,128) partials and apply the mean.
    return jnp.sum(partials) / jnp.float32(n)


def _reference(inputs, targets, alpha=0.1, gamma=2):
    x = inputs.reshape(-1).astype(jnp.float32)
    t = targets.reshape(-1).astype(jnp.float32)
    bce = jnp.maximum(x, 0.0) - x * t + jnp.log1p(jnp.exp(-jnp.abs(x)))
    at = jnp.where(t.astype(jnp.int32) == 1, 1.0 - alpha, alpha)
    pt = jnp.exp(-bce)
    return jnp.mean(at * (1.0 - pt) ** gamma * bce)


if __name__ == "__main__":
    key = jax.random.PRNGKey(0)
    k1, k2, k3, k4, k5, k6 = jax.random.split(key, 6)

    # 1) Small batch at the module's natural shapes: logits (N,), labels (N,1).
    N = 256
    inputs = jax.random.normal(k1, (N,), dtype=jnp.float32)
    targets = jax.random.bernoulli(k2, 0.3, (N, 1)).astype(jnp.float32)
    loss = jax.block_until_ready(weighted_focal_loss(inputs, targets, alpha=0.1, gamma=2))
    ref = _reference(inputs, targets, alpha=0.1, gamma=2)
    assert jnp.allclose(loss, ref, rtol=1e-4, atol=1e-6), (loss, ref)

    # 2) Ragged N (N % 128 != 0), several grid steps per core, partial edge block.
    N2 = 12700
    inputs2 = jax.random.normal(k3, (N2,), dtype=jnp.float32)
    targets2 = jax.random.bernoulli(k4, 0.3, (N2, 1)).astype(jnp.float32)
    loss2 = jax.block_until_ready(
        weighted_focal_loss(inputs2, targets2, alpha=0.25, gamma=2, block_rows=32))
    ref2 = _reference(inputs2, targets2, alpha=0.25, gamma=2)
    assert jnp.allclose(loss2, ref2, rtol=5e-4, atol=1e-6), (loss2, ref2)

    # 3) Exact multiple of 128*block_rows: zero-copy fast path, all-full blocks on
    #    both halves of the parallel split.
    N3 = 32768
    inputs3 = jax.random.normal(k5, (N3,), dtype=jnp.float32)
    targets3 = jax.random.bernoulli(k6, 0.3, (N3, 1)).astype(jnp.float32)
    loss3 = jax.block_until_ready(
        weighted_focal_loss(inputs3, targets3, alpha=0.1, gamma=2, block_rows=64))
    ref3 = _reference(inputs3, targets3, alpha=0.1, gamma=2)
    assert jnp.allclose(loss3, ref3, rtol=5e-4, atol=1e-6), (loss3, ref3)

    print("KERNEL_OK")
</pallas_src>

<mosaic_0001>
module attributes {stable_mosaic.version = 11 : i64} {
  func.func @_focal_sum_kernel(%arg0: i32, %arg1: i32, %arg2: memref<8x128xf32, #tpu.memory_space<vmem>>, %arg3: memref<8x128xf32, #tpu.memory_space<vmem>>, %arg4: memref<1x8x128xf32, #tpu.memory_space<vmem>>) attributes {dimension_semantics = [#tpu.dimension_semantics<parallel>, #tpu.dimension_semantics<arbitrary>], iteration_bounds = array<i64: 2, 1>, scalar_prefetch = 0 : i64, scratch_operands = 0 : i64, tpu.core_type = #tpu.core_type<tc>, window_params = [{transform_indices = @transform_0, window_bounds = array<i64: 8, 128>}, {transform_indices = @transform_1, window_bounds = array<i64: 8, 128>}, {transform_indices = @transform_2, window_bounds = array<i64: 1, 8, 128>}]} {
    %c1_i32 = arith.constant 1 : i32
    %0 = arith.muli %arg0, %c1_i32 : i32
    %1 = arith.addi %0, %arg1 : i32
    %c1024_i32 = arith.constant 1024 : i32
    %2 = arith.muli %1, %c1024_i32 : i32
    %c1024_i32_0 = arith.constant 1024 : i32
    %3 = arith.addi %2, %c1024_i32_0 : i32
    %c256_i32 = arith.constant 256 : i32
    %4 = arith.cmpi sle, %3, %c256_i32 : i32
    %c0_i32 = arith.constant 0 : i32
    %5 = arith.cmpi eq, %arg1, %c0_i32 : i32
    %6 = arith.extui %5 : i1 to i32
    %c0_i32_1 = arith.constant 0 : i32
    %7 = arith.cmpi ne, %6, %c0_i32_1 : i32
    scf.if %7 {
      %cst = arith.constant 0.000000e+00 : f32
      %13 = vector.broadcast %cst : f32 to vector<1x8x128xf32>
      %c0 = arith.constant 0 : index
      %c0_4 = arith.constant 0 : index
      %c0_5 = arith.constant 0 : index
      %14 = vector.load %arg4[%c0, %c0_4, %c0_5] : memref<1x8x128xf32, #tpu.memory_space<vmem>>, vector<1x8x128xf32>
      tpu.vector_store %arg4[%c0, %c0_4, %c0_5], %13 {strides = array<i32>} : memref<1x8x128xf32, #tpu.memory_space<vmem>>, vector<1x8x128xf32>,
    } else {
    }
    %8 = arith.extui %4 : i1 to i32
    %c0_i32_2 = arith.constant 0 : i32
    %9 = arith.cmpi ne, %8, %c0_i32_2 : i32
    scf.if %9 {
      %c0 = arith.constant 0 : index
      %c0_4 = arith.constant 0 : index
      %13 = vector.load %arg2[%c0, %c0_4] : memref<8x128xf32, #tpu.memory_space<vmem>>, vector<8x128xf32>
      %c0_5 = arith.constant 0 : index
      %c0_6 = arith.constant 0 : index
      %14 = vector.load %arg3[%c0_5, %c0_6] : memref<8x128xf32, #tpu.memory_space<vmem>>, vector<8x128xf32>
      %cst = arith.constant 0.000000e+00 : f32
      %15 = vector.broadcast %cst : f32 to vector<8x128xf32>
      %16 = arith.maximumf %13, %15 : vector<8x128xf32>
      %17 = arith.mulf %13, %14 : vector<8x128xf32>
      %18 = arith.subf %16, %17 : vector<8x128xf32>
      %19 = math.absf %13 : vector<8x128xf32>
      %cst_7 = arith.constant 0.000000e+00 : f32
      %20 = vector.broadcast %cst_7 : f32 to vector<8x128xf32>
      %21 = arith.subf %20, %19 : vector<8x128xf32>
      %22 = math.exp %21 : vector<8x128xf32>
      %23 = math.log1p %22 : vector<8x128xf32>
      %24 = arith.addf %18, %23 : vector<8x128xf32>
      %cst_8 = arith.constant 0.000000e+00 : f32
      %25 = vector.broadcast %cst_8 : f32 to vector<8x128xf32>
      %26 = arith.subf %25, %24 : vector<8x128xf32>
      %27 = math.exp %26 : vector<8x128xf32>
      %28 = arith.fptosi %14 : vector<8x128xf32> to vector<8x128xi32>
      %c1_i32_9 = arith.constant 1 : i32
      %29 = vector.broadcast %c1_i32_9 : i32 to vector<8x128xi32>
      %30 = arith.cmpi eq, %28, %29 : vector<8x128xi32>
      %cst_10 = arith.constant 0.899999976 : f32
      %cst_11 = arith.constant 1.000000e-01 : f32
      %31 = vector.broadcast %cst_10 : f32 to vector<8x128xf32>
      %32 = vector.broadcast %cst_11 : f32 to vector<8x128xf32>
      %33 = arith.select %30, %31, %32 : vector<8x128xi1>, vector<8x128xf32>
      %cst_12 = arith.constant 1.000000e+00 : f32
      %34 = vector.broadcast %cst_12 : f32 to vector<8x128xf32>
      %35 = arith.subf %34, %27 : vector<8x128xf32>
      %36 = arith.mulf %35, %35 : vector<8x128xf32>
      %37 = arith.mulf %33, %36 : vector<8x128xf32>
      %38 = arith.mulf %37, %24 : vector<8x128xf32>
      %39 = vector.shape_cast %38 : vector<8x128xf32> to vector<1x8x128xf32>
      %cst_13 = arith.constant dense<0.000000e+00> : vector<8x128xf32>
      %40 = vector.multi_reduction <add>, %39, %cst_13 [0] : vector<1x8x128xf32> to vector<8x128xf32>
      %c0_14 = arith.constant 0 : index
      %c0_15 = arith.constant 0 : index
      %c0_16 = arith.constant 0 : index
      %41 = vector.load %arg4[%c0_14, %c0_15, %c0_16] : memref<1x8x128xf32, #tpu.memory_space<vmem>>, vector<1x8x128xf32>
      %42 = vector.shape_cast %40 : vector<8x128xf32> to vector<1x8x128xf32>
      %43 = arith.addf %41, %42 : vector<1x8x128xf32>
      %c0_17 = arith.constant 0 : index
      %c0_18 = arith.constant 0 : index
      %c0_19 = arith.constant 0 : index
      %44 = vector.load %arg4[%c0_17, %c0_18, %c0_19] : memref<1x8x128xf32, #tpu.memory_space<vmem>>, vector<1x8x128xf32>
      tpu.vector_store %arg4[%c0_17, %c0_18, %c0_19], %43 {strides = array<i32>} : memref<1x8x128xf32, #tpu.memory_space<vmem>>, vector<1x8x128xf32>,
    } else {
    }
    %true = arith.constant true
    %10 = arith.xori %4, %true : i1
    %11 = arith.extui %10 : i1 to i32
    %c0_i32_3 = arith.constant 0 : i32
    %12 = arith.cmpi ne, %11, %c0_i32_3 : i32
    scf.if %12 {
      %13 = tpu.iota {dimensions = array<i32: 0>} : vector<8x128xi32>
      %14 = tpu.iota {dimensions = array<i32: 1>} : vector<8x128xi32>
      %c128_i32 = arith.constant 128 : i32
      %15 = vector.broadcast %c128_i32 : i32 to vector<8x128xi32>
      %16 = arith.muli %13, %15 : vector<8x128xi32>
      %17 = vector.broadcast %2 : i32 to vector<8x128xi32>
      %18 = arith.addi %17, %16 : vector<8x128xi32>
      %19 = arith.addi %18, %14 : vector<8x128xi32>
      %c256_i32_4 = arith.constant 256 : i32
      %20 = vector.broadcast %c256_i32_4 : i32 to vector<8x128xi32>
      %21 = arith.cmpi slt, %19, %20 : vector<8x128xi32>
      %c0 = arith.constant 0 : index
      %c0_5 = arith.constant 0 : index
      %22 = vector.load %arg2[%c0, %c0_5] : memref<8x128xf32, #tpu.memory_space<vmem>>, vector<8x128xf32>
      %cst = arith.constant 0.000000e+00 : f32
      %23 = vector.broadcast %cst : f32 to vector<8x128xf32>
      %24 = arith.select %21, %22, %23 : vector<8x128xi1>, vector<8x128xf32>
      %c0_6 = arith.constant 0 : index
      %c0_7 = arith.constant 0 : index
      %25 = vector.load %arg3[%c0_6, %c0_7] : memref<8x128xf32, #tpu.memory_space<vmem>>, vector<8x128xf32>
      %cst_8 = arith.constant 0.000000e+00 : f32
      %26 = vector.broadcast %cst_8 : f32 to vector<8x128xf32>
      %27 = arith.select %21, %25, %26 : vector<8x128xi1>, vector<8x128xf32>
      %cst_9 = arith.constant 0.000000e+00 : f32
      %28 = vector.broadcast %cst_9 : f32 to vector<8x128xf32>
      %29 = arith.maximumf %24, %28 : vector<8x128xf32>
      %30 = arith.mulf %24, %27 : vector<8x128xf32>
      %31 = arith.subf %29, %30 : vector<8x128xf32>
      %32 = math.absf %24 : vector<8x128xf32>
      %cst_10 = arith.constant 0.000000e+00 : f32
      %33 = vector.broadcast %cst_10 : f32 to vector<8x128xf32>
      %34 = arith.subf %33, %32 : vector<8x128xf32>
      %35 = math.exp %34 : vector<8x128xf32>
      %36 = math.log1p %35 : vector<8x128xf32>
      %37 = arith.addf %31, %36 : vector<8x128xf32>
      %cst_11 = arith.constant 0.000000e+00 : f32
      %38 = vector.broadcast %cst_11 : f32 to vector<8x128xf32>
      %39 = arith.subf %38, %37 : vector<8x128xf32>
      %40 = math.exp %39 : vector<8x128xf32>
      %41 = arith.fptosi %27 : vector<8x128xf32> to vector<8x128xi32>
      %c1_i32_12 = arith.constant 1 : i32
      %42 = vector.broadcast %c1_i32_12 : i32 to vector<8x128xi32>
      %43 = arith.cmpi eq, %41, %42 : vector<8x128xi32>
      %cst_13 = arith.constant 0.899999976 : f32
      %cst_14 = arith.constant 1.000000e-01 : f32
      %44 = vector.broadcast %cst_13 : f32 to vector<8x128xf32>
      %45 = vector.broadcast %cst_14 : f32 to vector<8x128xf32>
      %46 = arith.select %43, %44, %45 : vector<8x128xi1>, vector<8x128xf32>
      %cst_15 = arith.constant 1.000000e+00 : f32
      %47 = vector.broadcast %cst_15 : f32 to vector<8x128xf32>
      %48 = arith.subf %47, %40 : vector<8x128xf32>
      %49 = arith.mulf %48, %48 : vector<8x128xf32>
      %50 = arith.mulf %46, %49 : vector<8x128xf32>
      %51 = arith.mulf %50, %37 : vector<8x128xf32>
      %cst_16 = arith.constant 0.000000e+00 : f32
      %52 = vector.broadcast %cst_16 : f32 to vector<8x128xf32>
      %53 = arith.select %21, %51, %52 : vector<8x128xi1>, vector<8x128xf32>
      %54 = vector.shape_cast %53 : vector<8x128xf32> to vector<1x8x128xf32>
      %cst_17 = arith.constant dense<0.000000e+00> : vector<8x128xf32>
      %55 = vector.multi_reduction <add>, %54, %cst_17 [0] : vector<1x8x128xf32> to vector<8x128xf32>
      %c0_18 = arith.constant 0 : index
      %c0_19 = arith.constant 0 : index
      %c0_20 = arith.constant 0 : index
      %56 = vector.load %arg4[%c0_18, %c0_19, %c0_20] : memref<1x8x128xf32, #tpu.memory_space<vmem>>, vector<1x8x128xf32>
      %57 = vector.shape_cast %55 : vector<8x128xf32> to vector<1x8x128xf32>
      %58 = arith.addf %56, %57 : vector<1x8x128xf32>
      %c0_21 = arith.constant 0 : index
      %c0_22 = arith.constant 0 : index
      %c0_23 = arith.constant 0 : index
      %59 = vector.load %arg4[%c0_21, %c0_22, %c0_23] : memref<1x8x128xf32, #tpu.memory_space<vmem>>, vector<1x8x128xf32>
      tpu.vector_store %arg4[%c0_21, %c0_22, %c0_23], %58 {strides = array<i32>} : memref<1x8x128xf32, #tpu.memory_space<vmem>>, vector<1x8x128xf32>,
    } else {
    }
    return
  }
  func.func @transform_0(%arg0: i32, %arg1: i32) -> (i32, i32) {
    %c1_i32 = arith.constant 1 : i32
    %0 = arith.muli %arg0, %c1_i32 : i32
    %1 = arith.addi %0, %arg1 : i32
    %c0_i32 = arith.constant 0 : i32
    %2 = arith.minsi %1, %c0_i32 : i32
    %c0_i32_0 = arith.constant 0 : i32
    %c0_i32_1 = arith.constant 0 : i32
    return %2, %c0_i32_0 : i32, i32
  }
  func.func @transform_1(%arg0: i32, %arg1: i32) -> (i32, i32) {
    %c1_i32 = arith.constant 1 : i32
    %0 = arith.muli %arg0, %c1_i32 : i32
    %1 = arith.addi %0, %arg1 : i32
    %c0_i32 = arith.constant 0 : i32
    %2 = arith.minsi %1, %c0_i32 : i32
    %c0_i32_0 = arith.constant 0 : i32
    %c0_i32_1 = arith.constant 0 : i32
    return %2, %c0_i32_0 : i32, i32
  }
  func.func @transform_2(%arg0: i32, %arg1: i32) -> (i32, i32, i32) {
    %c0_i32 = arith.constant 0 : i32
    %c0_i32_0 = arith.constant 0 : i32
    %c0_i32_1 = arith.constant 0 : i32
    return %arg0, %c0_i32, %c0_i32_0 : i32, i32, i32
  }
}

</mosaic_0001>

<bundles_post_ra>
// kernel: tpu_custom_call.1
= control target key start
LH: loop header
LB: loop body
LE: loop exit
PB: predicated region body
PF: predicated region fallthrough
CT: control target
= control target key end

     0   :  { %7 = vsyncpa [#allocation3], 0  ;;  %s969_s0 = inlined_call_operand.hbm [shape: f32[2,128], index: 0, kind: input, shape index: {}]   ;;  %s970_s1 = inlined_call_operand.hbm [shape: f32[2,128], index: 1, kind: input, shape index: {}]   ;;  %s971_s2 = inlined_call_operand.hbm [shape: f32[2,8,128], index: 2, kind: output, shape index: {}]  }
   0x1   :  { %9 = vsyncpa [#allocation3 + $0x1], 0 }
   0x2   :  { %10 = vsyncpa [#allocation6], 0 }
   0x3   :  { %12 = vsyncpa [#allocation6 + $0x1], 0 }
   0x4   :  { %13 = vsyncpa [#allocation4], 0 }
   0x5   :  { %15 = vsyncpa [#allocation4 + $0x1], 0  ;;  %s784_s9 = smov 0   ;;  %s786_s10 = smov 0  }
   0x6   :  { %s788_s11 = smov 0   ;;  %s790_s12 = smov 0  }
   0x7   :  { %s792_s13 = smov 0   ;;  %s794_s14 = smov 0  }
   0x8   :  { %s796_s15 = smov 0   ;;  %s798_s16 = smov 0  }
   0x9 LB: > { %s461_s17 = sadd.s32 4294967295, %s757_s16   ;;  %s462_s18 = sadd.s32 4294967294, %s757_s16   ;;  %s757_s16 = sphi %s798_s16, %s21_s16   ;;  %s753_s15 = sphi %s796_s15, %s983_s15   ;;  %s749_s14 = sphi %s794_s14, %s982_s14   ;;  %s745_s13 = sphi %s792_s13, %s959_s13   ;;  %s741_s12 = sphi %s790_s12, %s981_s12   ;;  %s737_s11 = sphi %s788_s11, %s980_s11   ;;  %s733_s10 = sphi %s786_s10, %s979_s10   ;;  %s729_s9 = sphi %s784_s9, %s978_s9  }
   0xa   : > { %s33_s19 = sadd.s32 1, %s753_s15  ;;  %p726_p1 = scmp.ne.s32.totalorder %s745_s13, 0 }
   0xb   : > { %p35_p0 = scmp.ge.s32.totalorder %s33_s19, 2  ;;  %p54_p2 = scmp.eq.s32.totalorder %s757_s16, 0 }
   0xc   : > { %p59_p3 = scmp.ne.s32.totalorder %s745_s13, %s741_s12  ;;  %p60_p5 = scmp.eq.s32.totalorder %s461_s17, 0 }
   0xd   : > { %s985_s19 = smov (%p35_p0, %s33_s19), 0  ;;  %p830_p4 = por %p726_p1, %p54_p2 }
   0xe   : > { %p834_p6 = por %p60_p5, %p59_p3  ;;  %s101_s22 = ssub.s32 %s753_s15, %s985_s19 }
   0xf   : > { %p102_p7 = scmp.eq.s32.totalorder %s101_s22, 0  ;;  %s104_s23 = sadd.s32 1, %s737_s11 }
  0x10   : > { %p114_p8 = scmp.ne.s32.totalorder %s737_s11, %s733_s10  ;;  %p115_p9 = scmp.eq.s32.totalorder %s461_s17, 1 }
  0x11   : > { %s842_s24 = scalar_select %p102_p7, %s737_s11, %s104_s23  }
  0x12   : > { %p120_p10 = scmp.ne.s32.totalorder %s733_s10, %s729_s9  ;;  %p121_p11 = scmp.eq.s32.totalorder %s462_s18, 1 }
  0x13   : > { %p848_p12 = por %p115_p9, %p114_p8  ;;  %p972_p0 = scmp.ge.s32.totalorder %s757_s16, 2 }
  0x14   : > { %p852_p13 = por %p121_p11, %p120_p10 }
  0x15   : > { %137 = sbr.rel (%p972_p0) target bundleno = 72 (0x48), region = 16 }
  0x1a   : > { %140 = sbr.rel (!%p830_p4) target bundleno = 49 (0x31), region = 20 }
  0x1f   : > { %154 = vsyncadd [#allocation3], 96  ;;  %s759_s27 = smov [#allocation2]   ;;  %s596_s3 = scalar_lea.hbm %s969_s0, 32 }
  0x20   : > { %s159_s28 = sshll.u32 %s759_s27, 4  ;;  %p597_p1 = scmp.ne.s32.totalorder %s969_s0, %s596_s3  ;;  %s160_s28 = int_to_ptr.vmem [resolvable:$true] %s159_s28 }
  0x21   : > { %p602_p2 = scmp.lt.s32.totalorder %s596_s3, %s596_s3 }
  0x23   : > { %p604_p3 = pnand %p602_p2, %p597_p1 }
  0x25   : > { %607 = shalt.err (!%p604_p3)
}
  0x26   : > { %s608_s6 = scalar_lea.vmem %s160_s28, 32  ;;  %s614_s7 = scalar_lea.vmem %s160_s28, 256 }
  0x27   : > { %p609_p5 = scmp.ne.s32.totalorder %s160_s28, %s608_s6  ;;  %p615_p7 = scmp.lt.s32.totalorder %s160_s28, %s160_s28 }
  0x28   : > { %p616_p8 = scmp.lt.s32.totalorder %s614_s7, %s608_s6 }
  0x2a   : > { %p617_p9 = por %p616_p8, %p615_p7 }
  0x2c   : > { %p618_p10 = pnand %p617_p9, %p609_p5 }
  0x2e   : > { %621 = shalt.err (!%p618_p10)
}
  0x2f   : > { %s760_s8 = smov 32   ;;  %s761_s12 = smov 2  }
  0x30   : > { %165 = dma.hbm_to_vmem [thread:$0]  %s969_s0, 32, %s160_s28, [#allocation3], %s760_s8, %s760_s8, %s761_s12  }
  0x31 PF: > { %168 = sbr.rel (!%p830_p4) target bundleno = 72 (0x48), region = 24 }
  0x36   : > { %182 = vsyncadd [#allocation6], 96  ;;  %s762_s22 = smov [#allocation5]   ;;  %s622_s30 = scalar_lea.hbm %s970_s1, 32 }
  0x37   : > { %s187_s23 = sshll.u32 %s762_s22, 4  ;;  %p623_p11 = scmp.ne.s32.totalorder %s970_s1, %s622_s30  ;;  %s188_s23 = int_to_ptr.vmem [resolvable:$true] %s187_s23 }
  0x38   : > { %p628_p1 = scmp.lt.s32.totalorder %s622_s30, %s622_s30 }
  0x3a   : > { %p630_p2 = pnand %p628_p1, %p623_p11 }
  0x3c   : > { %633 = shalt.err (!%p630_p2)
}
  0x3d   : > { %s634_s28 = scalar_lea.vmem %s188_s23, 32  ;;  %s640_s5 = scalar_lea.vmem %s188_s23, 256 }
  0x3e   : > { %p635_p3 = scmp.ne.s32.totalorder %s188_s23, %s634_s28  ;;  %p641_p5 = scmp.lt.s32.totalorder %s188_s23, %s188_s23 }
  0x3f   : > { %p642_p4 = scmp.lt.s32.totalorder %s640_s5, %s634_s28 }
  0x41   : > { %p643_p7 = por %p642_p4, %p641_p5 }
  0x43   : > { %p644_p8 = pnand %p643_p7, %p635_p3 }
  0x45   : > { %647 = shalt.err (!%p644_p8)
}
  0x46   : > { %s763_s20 = smov 32   ;;  %s764_s6 = smov 2  }
  0x47   : > { %193 = dma.hbm_to_vmem [thread:$0]  %s970_s1, 32, %s188_s23, [#allocation6], %s763_s20, %s763_s20, %s764_s6  }
  0x48 PF: > { %p479_p9 = scmp.ge.s32.totalorder %s757_s16, 1  ;;  %p195_p10 = scmp.lt.s32.totalorder %s757_s16, 3 }
  0x4a   : > { %p196_p11 = pnand %p479_p9, %p195_p10 }
  0x4b   : > { %s201_s12 = sand.u32 (!%p196_p11), 1, %s745_s13  }
  0x4c   : > { %199 = sbr.rel (%p196_p11) target bundleno = 277 (0x115), region = 28  ;;  %s480_s17 = sshll.u32 (!%p196_p11), %s201_s12, 3 }
  0x4d   : > { %s202_s18 = scalar_lea.sflag (!%p196_p11), [#allocation3], %s201_s12  ;;  %s884_s22 = scalar_lea.vmem (!%p196_p11), [#allocation2], %s480_s17 }
  0x51   : > { %711 = dma.done.wait (%p834_p6), %s202_s18, 128  }
  0x52   : > { %713 = vsyncadd (%p834_p6), %s202_s18, 4294967168  ;;  %s211_s23 = scalar_lea.sflag [#allocation6], %s201_s12  ;;  %s890_s27 = scalar_lea.vmem [#allocation5], %s480_s17 }
  0x53   : > { %715 = dma.done.wait (%p834_p6), %s211_s23, 128  }
  0x54   : > { %717 = vsyncadd (%p834_p6), %s211_s23, 4294967168  ;;  %s237_s29 = sand.u32 1, %s733_s10   ;;  %s483_s30 = sshll.u32 %s749_s14, 10  ;;  %v765_v0 = vmov 0.0  }
  0x55   : > { %s482_s3 = sshll.u32 %s237_s29, 3  ;;  %s902_s4 = sadd.s32 1024, %s483_s30 }
  0x56   : > { %s904_s28 = scalar_lea.vmem [#allocation7], %s482_s3  ;;  %p484_p1 = scmp.gt.s32.totalorder %s902_s4, 256 }
  0x57   : > { %260 = vst [vmem:[%s904_s28] sm:$0xff] %v765_v0 }
  0x58   : > { %263 = sbr.rel (%p484_p1) target bundleno = 164 (0xa4), region = 44 }
  0x5d   : > { %v264_v1 = vld [vmem:[%s884_s22] sm:$0xff]  ;;  %v265_v8 = vld [vmem:[%s890_s27] sm:$0xff]  ;;  %v766_v25 = vmov 0.1  }
  0x5e   : > { %v269_v2 = vand.u32 2147483647, %v264_v1  ;;  %v266_v10 = vmax.f32 %v264_v1, 0.0  ;;  %v267_v11 = vmul.f32 %v265_v8, %v264_v1  ;;  %v492_v21 = vtrunc.f32 %v265_v8  ;;  %v294_v29 = vld [vmem:[%s904_s28] sm:$0xff] }
  0x60   : > { %v270_v3 = vsub.f32 0.0, %v269_v2  ;;  %v268_v15 = vsub.f32 %v266_v10, %v267_v11  ;;  %v493_v22 = vcvt.f32.s32 %v492_v21 }
  0x62   : > { %v271_v4 = vmul.f32 1.442695, %v270_v3  ;;  %vm287_vm1 = vcmp.eq.s32.totalorder %v493_v22, 1 }
  0x63   : > { %v288_v26 = vsel %vm287_vm1, 0.9, %v766_v25 }
  0x64   : > { %584 = vpow2.f32 %v271_v4 }
  0x71   : > { %v585_v5 = vpop.eup %584 }
  0x72   : > { %v273_v6 = vadd.f32 1.0, %v585_v5  ;;  %v276_v7 = vmul.f32 -0.5, %v585_v5  ;;  %v279_v12 = vand.u32 2147483647, %v585_v5 }
  0x74   : > { %586 = vlog2.f32 %v273_v6  ;;  %v277_v9 = vadd.f32 1.0, %v276_v7  ;;  %vm280_vm0 = vcmp.lt.f32.partialorder %v279_v12, 0.0004427343 }
  0x76   : > { %v278_v13 = vmul.f32 %v585_v5, %v277_v9 }
  0x81   : > { %v587_v14 = vpop.eup %586 }
  0x82   : > { %v275_v16 = vmul.f32 0.6931472, %v587_v14 }
  0x84   : > { %v281_v17 = vsel %vm280_vm0, %v278_v13, %v275_v16 }
  0x85   : > { %v282_v18 = vadd.f32 %v281_v17, %v268_v15 }
  0x87   : > { %v283_v19 = vsub.f32 0.0, %v282_v18 }
  0x89   : > { %v284_v20 = vmul.f32 1.442695, %v283_v19 }
  0x8b   : > { %588 = vpow2.f32 %v284_v20 }
  0x98   : > { %v589_v23 = vpop.eup %588 }
  0x99   : > { %v289_v24 = vsub.f32 1.0, %v589_v23 }
  0x9b   : > { %v290_v27 = vmul.f32 %v289_v24, %v289_v24 }
  0x9d   : > { %v291_v28 = vmul.f32 %v290_v27, %v288_v26 }
  0x9f   : > { %v292_v30 = vmul.f32 %v291_v28, %v282_v18 }
  0xa1   : > { %v295_v31 = vadd.f32 %v294_v29, %v292_v30 }
  0xa3   : > { %296 = vst [vmem:[%s904_s28] sm:$0xff] %v295_v31 }
  0xa4 PF: > { %p485_p6 = scmp.le.s32.totalorder %s902_s4, 256 }
  0xa6   : > { %300 = sbr.rel (%p485_p6) target bundleno = 254 (0xfe), region = 48 }
  0xab   : > { %v301_v32 = vlaneseq  ;;  %v306_v34 = vstv %s483_s30  ;;  %v310_v39 = vld [vmem:[%s884_s22] sm:$0xff]  ;;  %v312_v46 = vld [vmem:[%s890_s27] sm:$0xff]  ;;  %v767_v1 = vmov 0.1  }
  0xac   : > { %v343_v6 = vld [vmem:[%s904_s28] sm:$0xff] }
  0xad   : > { %v302_v33 = vshrl.u32 %v301_v32, 7  ;;  %v304_v35 = vand.u32 127, %v301_v32 }
  0xaf   : > { %v305_v36 = vmul.u32 128, %v302_v33 }
  0xb1   : > { %v307_v37 = vadd.s32 %v306_v34, %v305_v36 }
  0xb3   : > { %v308_v38 = vadd.s32 %v307_v37, %v304_v35 }
  0xb5   : > { %vm309_vm2 = vcmp.lt.s32.totalorder %v308_v38, 256 }
  0xb6   : > { %v311_v40 = vsel %vm309_vm2, %v310_v39, 0.0  ;;  %v313_v48 = vsel %vm309_vm2, %v312_v46, 0.0 }
  0xb7   : > { %v317_v41 = vand.u32 2147483647, %v311_v40  ;;  %v314_v50 = vmax.f32 %v311_v40, 0.0  ;;  %v315_v51 = vmul.f32 %v313_v48, %v311_v40  ;;  %v494_v61 = vtrunc.f32 %v313_v48 }
  0xb9   : > { %v318_v42 = vsub.f32 0.0, %v317_v41  ;;  %v316_v55 = vsub.f32 %v314_v50, %v315_v51  ;;  %v495_v62 = vcvt.f32.s32 %v494_v61 }
  0xbb   : > { %v319_v43 = vmul.f32 1.442695, %v318_v42  ;;  %vm335_vm4 = vcmp.eq.s32.totalorder %v495_v62, 1 }
  0xbc   : > { %v336_v2 = vsel %vm335_vm4, 0.9, %v767_v1 }
  0xbd   : > { %590 = vpow2.f32 %v319_v43 }
  0xca   : > { %v591_v44 = vpop.eup %590 }
  0xcb   : > { %v321_v45 = vadd.f32 1.0, %v591_v44  ;;  %v324_v47 = vmul.f32 -0.5, %v591_v44  ;;  %v327_v52 = vand.u32 2147483647, %v591_v44 }
  0xcd   : > { %592 = vlog2.f32 %v321_v45  ;;  %v325_v49 = vadd.f32 1.0, %v324_v47  ;;  %vm328_vm3 = vcmp.lt.f32.partialorder %v327_v52, 0.0004427343 }
  0xcf   : > { %v326_v53 = vmul.f32 %v591_v44, %v325_v49 }
  0xda   : > { %v593_v54 = vpop.eup %592 }
  0xdb   : > { %v323_v56 = vmul.f32 0.6931472, %v593_v54 }
  0xdd   : > { %v329_v57 = vsel %vm328_vm3, %v326_v53, %v323_v56 }
  0xde   : > { %v330_v58 = vadd.f32 %v329_v57, %v316_v55 }
  0xe0   : > { %v331_v59 = vsub.f32 0.0, %v330_v58 }
  0xe2   : > { %v332_v60 = vmul.f32 1.442695, %v331_v59 }
  0xe4   : > { %594 = vpow2.f32 %v332_v60 }
  0xf1   : > { %v595_v63 = vpop.eup %594 }
  0xf2   : > { %v337_v0 = vsub.f32 1.0, %v595_v63 }
  0xf4   : > { %v338_v3 = vmul.f32 %v337_v0, %v337_v0 }
  0xf6   : > { %v339_v4 = vmul.f32 %v338_v3, %v336_v2 }
  0xf8   : > { %v340_v5 = vmul.f32 %v339_v4, %v330_v58 }
  0xfa   : > { %v341_v7 = vsel %vm309_vm2, %v340_v5, 0.0 }
  0xfb   : > { %v344_v8 = vadd.f32 %v343_v6, %v341_v7 }
  0xfd   : > { %345 = vst [vmem:[%s904_s28] sm:$0xff] %v344_v8 }
  0xfe PF: > { %s487_s21 = sshll.u32 %s749_s14, 7  ;;  %s360_s7 = sshll.u32 %s904_s28, 4  ;;  %s361_s7 = int_to_ptr.vmem [resolvable:$true] %s360_s7 }
  0xff   : > { %s358_s6 = scalar_lea.hbm %s971_s2, %s487_s21  ;;  %s347_s8 = scalar_lea.sflag [#allocation4], %s237_s29 }
 0x100   : > { %s648_s12 = scalar_lea.vmem %s361_s7, 128  ;;  %s768_s17 = smov [#allocation7]  }
 0x101   : > { %p649_p2 = scmp.ne.s32.totalorder %s361_s7, %s648_s12  ;;  %s652_s18 = sshll.u32 %s768_s17, 4  ;;  %s653_s18 = int_to_ptr.vmem [resolvable:$false] %s652_s18 }
 0x102   : > { %s654_s22 = scalar_lea.vmem %s653_s18, 256  ;;  %p655_p4 = scmp.lt.s32.totalorder %s361_s7, %s653_s18 }
 0x103   : > { %p650_p3 = pnand %p649_p2, %p848_p12  ;;  %p656_p7 = scmp.lt.s32.totalorder %s654_s22, %s648_s12 }
 0x105   : > { %p651_p5 = pneg %p650_p3  ;;  %p657_p8 = por %p656_p7, %p655_p4 }
 0x107   : > { %p658_p9 = pnand %p657_p8, %p651_p5 }
 0x109   : > { %661 = shalt.err (!%p658_p9)
}
 0x10a   : > { %s662_s14 = scalar_lea.hbm %s358_s6, 128  ;;  %s666_s29 = scalar_lea.hbm %s971_s2, 256 }
 0x10b   : > { %p663_p10 = scmp.ne.s32.totalorder %s358_s6, %s662_s14  ;;  %p667_p6 = scmp.lt.s32.totalorder %s358_s6, %s971_s2 }
 0x10c   : > { %p668_p2 = scmp.lt.s32.totalorder %s666_s29, %s662_s14 }
 0x10d   : > { %p664_p11 = pnand %p663_p10, %p848_p12 }
 0x10e   : > { %p669_p3 = por %p668_p2, %p667_p6 }
 0x10f   : > { %p665_p1 = pneg %p664_p11 }
 0x111   : > { %p670_p0 = pnand %p669_p3, %p665_p1 }
 0x113   : > { %673 = shalt.err (!%p670_p0)
}
 0x114   : > { %498 = dma.vmem_to_hbm [thread:$0]  (%p848_p12), %s361_s7, 128, %s358_s6, %s347_s8  }
 0x115 PF: > { %s372_s4 = sand.u32 1, %s729_s9   ;;  %p977_p5 = scmp.ge.s32.totalorder %s757_s16, 2 }
 0x116   : > { %s373_s28 = scalar_lea.sflag [#allocation4], %s372_s4 }
 0x117   : > { %p501_p4 = pnand %p977_p5, %p852_p13 }
 0x119   : > { %p502_p7 = pneg %p501_p4 }
 0x11b   : > { %719 = dma.done.wait (%p502_p7), %s373_s28, 128  }
 0x11c   : > { %721 = vsyncadd (%p502_p7), %s373_s28, 4294967168  ;;  %s21_s16 = sadd.s32 1, %s757_s16   ;;  %s978_s9 = smov %s733_s10 }
 0x11d   : > { %p18_p8 = scmp.ge.s32.totalorder %s21_s16, 4   ;;  %s979_s10 = smov %s737_s11 }
 0x11e   : > { %s980_s11 = smov %s842_s24  ;;  %s981_s12 = smov %s745_s13 }
 0x11f   : > { %s959_s13 = smov 0   ;;  %s982_s14 = smov %s753_s15 }
 0x120   : > { %s983_s15 = smov %s985_s19  ;;  %20 = sbr.rel (!%p18_p8) target bundleno = 9 (0x9), region = 98 }
 0x125   :  { %378 = vsyncpa [#allocation3], 1 }
 0x126   :  { %380 = vsyncpa [#allocation3 + $0x1], 1 }
 0x127   :  { %381 = vsyncpa [#allocation6], 1 }
 0x128   :  { %383 = vsyncpa [#allocation6 + $0x1], 1 }
 0x129   :  { %384 = vsyncpa [#allocation4], 1 }
 0x12a   :  { %386 = vsyncpa [#allocation4 + $0x1], 1 }

</bundles_post_ra>
